<compile_context>
chip_gen: v5e
topology: v5e:2x2
jax: 0.10.0
libtpu: 0.0.40
codegen_flags: <defaults>
</compile_context>

<pallas_src>
import math

import jax
import jax.numpy as jnp
from jax.experimental import pallas as pl
from jax.experimental.pallas import tpu as pltpu


def _mask_layer_kernel(x_ref, b_ref, o_ref):
    # x_ref/o_ref: (RT, LT)   b_ref: (1, LT) broadcast over the sublane axis.
    o_ref[...] = x_ref[...].astype(o_ref.dtype) + b_ref[...]


def mask_layer_forward(x, mask, *, target_block_bytes=4 << 20):
    """Apply `x - 1 + |mask|` with mask broadcast along the last dim of x."""
    size = mask.shape[0]
    assert x.shape[-1] == size, "last dim of input must equal mask size"
    orig_shape = x.shape

    # Match torch promotion: result dtype = promote(input.dtype, mask.dtype).
    out_dtype = jnp.result_type(x.dtype, mask.dtype)
    itemsize_in = jnp.dtype(x.dtype).itemsize
    itemsize_out = jnp.dtype(out_dtype).itemsize

    # Fold |mask| - 1 once in the wrapper (tiny (size,) op) in the out dtype.
    bias = jnp.abs(mask).astype(out_dtype) - jnp.asarray(1, dtype=out_dtype)

    # ---- Lane-dense layout: fold trailing leading dims into the lane axis
    # until it is >= 128 lanes, but never blow it past LANE_CAP (keeps blocks
    # VMEM-sized and preserves a multi-step row grid for pipelining).
    LANE_CAP = 8192
    lanes = size
    fold = 1
    lead = list(orig_shape[:-1])
    while lanes < 128 and lead:
        d = lead[-1]
        if lanes * d <= LANE_CAP:
            lead.pop()
            lanes *= d
            fold *= d
            continue
        # Dim too big to fold whole: split off the smallest divisor that makes
        # the lane axis >= 128 lanes.
        need = -(-128 // lanes)
        cap = LANE_CAP // lanes
        f = 0
        for cand in range(need, cap + 1):
            if d % cand == 0:
                f = cand
                break
        if f == 0:
            break  # no usable divisor; accept lanes < 128 (still correct)
        lead[-1] = d // f
        lanes *= f
        fold *= f
        break
    rows = math.prod(lead) if lead else 1

    x2d = x.reshape(rows, lanes)                       # free reshape (no copy)
    bias_row = jnp.tile(bias, fold).reshape(1, lanes)  # tiny, <= LANE_CAP elems

    # Sublane packing granularity for the row-block height.
    sub = max(8, 32 // min(itemsize_in, itemsize_out))

    # ---- Lane tiling: only when even a minimal-height row block is over
    # budget (very large `size`); lane tile must be a multiple of 128.
    if lanes > 128 and sub * lanes * itemsize_in > target_block_bytes:
        lt = max(128, (target_block_bytes // (sub * itemsize_in)) // 128 * 128)
        if lt >= lanes:
            lt = lanes
    else:
        lt = lanes

    # ---- Row tiling: largest multiple of `sub` under the block budget.
    row_block_bytes = lt * itemsize_in
    if rows <= sub:
        rt = rows
    else:
        rows8 = pl.cdiv(rows, sub) * sub
        rt = max(sub, (target_block_bytes // row_block_bytes) // sub * sub)
        rt = min(rt, rows8)
        # v7x megacore: aim for >= 4 grid steps (>= 2 pipelined steps per TC)
        # whenever each step still moves >= 256 KiB, so the ~0.35us per-step
        # overhead stays negligible on single-TC chips (v5e/v6e).
        MIN_STEPS = 4
        step_rows = (rows8 // MIN_STEPS) // sub * sub
        if step_rows >= sub and step_rows * row_block_bytes >= (256 << 10):
            rt = min(rt, step_rows)
        if rt >= rows:
            rt = rows  # single full-extent block (always legal)

    grid = (pl.cdiv(rows, rt), pl.cdiv(lanes, lt))

    # Explicit scoped-VMEM limit: covers double-buffered in+out blocks and
    # lifts v5e's 16 MiB default; stays well under v7x's 64 MiB physical VMEM.
    needed = 2 * (rt * lt * itemsize_in + rt * lt * itemsize_out
                  + lt * itemsize_out) + (2 << 20)
    vmem_limit = int(min(max(needed, 32 << 20), 48 << 20))

    out2d = pl.pallas_call(
        _mask_layer_kernel,
        out_shape=jax.ShapeDtypeStruct((rows, lanes), out_dtype),
        grid_spec=pltpu.PrefetchScalarGridSpec(
            num_scalar_prefetch=0,
            grid=grid,
            in_specs=[
                pl.BlockSpec((rt, lt), lambda i, j: (i, j)),
                pl.BlockSpec((1, lt), lambda i, j: (0, j)),
            ],
            out_specs=pl.BlockSpec((rt, lt), lambda i, j: (i, j)),
        ),
        compiler_params=pltpu.CompilerParams(
            dimension_semantics=("parallel", "parallel"),
            vmem_limit_bytes=vmem_limit,
        ),
        # TODO(synk): optionally add input_output_aliases={0: 0} when the
        # caller donates x and dtypes match, to drop the extra HBM allocation.
    )(x2d, bias_row)

    return out2d.reshape(orig_shape)


if __name__ == "__main__":
    # Small NCHW-style input; mask size = last spatial dim (16).
    B, C, H, W = 2, 4, 16, 16
    size = W

    key = jax.random.PRNGKey(0)
    k1, k2 = jax.random.split(key)
    x = jax.random.normal(k1, (B, C, H, W), dtype=jnp.float32)

    # Deterministic parameter init identical to nn.Parameter(torch.ones(size)).
    mask = jnp.ones((size,), dtype=jnp.float32)

    out = mask_layer_forward(x, mask)
    out = jax.block_until_ready(out)

    ref = x - 1.0 + jnp.abs(mask)
    assert out.shape == x.shape
    assert jnp.allclose(out, ref, atol=1e-6), "mismatch vs reference"

    # Extra check: force a non-divisible row grid (partial last block) to
    # exercise Pallas's boundary masking path used instead of pad/slice.
    x2 = jax.random.normal(k2, (3, 7, 16, 16), dtype=jnp.float32)
    out2 = jax.block_until_ready(
        mask_layer_forward(x2, mask, target_block_bytes=8 << 10))
    ref2 = x2 - 1.0 + jnp.abs(mask)
    assert jnp.allclose(out2, ref2, atol=1e-6), "mismatch on partial blocks"

    print("KERNEL_OK")
</pallas_src>

<mosaic_0001>
module attributes {stable_mosaic.version = 11 : i64} {
  func.func @_mask_layer_kernel(%arg0: i32, %arg1: i32, %arg2: memref<8x256xf32, #tpu.memory_space<vmem>>, %arg3: memref<1x256xf32, #tpu.memory_space<vmem>>, %arg4: memref<8x256xf32, #tpu.memory_space<vmem>>) attributes {dimension_semantics = [#tpu.dimension_semantics<parallel>, #tpu.dimension_semantics<parallel>], iteration_bounds = array<i64: 1, 1>, scalar_prefetch = 0 : i64, scratch_operands = 0 : i64, tpu.core_type = #tpu.core_type<tc>, window_params = [{transform_indices = @transform_0, window_bounds = array<i64: 8, 256>}, {transform_indices = @transform_1, window_bounds = array<i64: 1, 256>}, {transform_indices = @transform_2, window_bounds = array<i64: 8, 256>}]} {
    %c0 = arith.constant 0 : index
    %c0_0 = arith.constant 0 : index
    %0 = vector.load %arg2[%c0, %c0_0] : memref<8x256xf32, #tpu.memory_space<vmem>>, vector<8x256xf32>
    %c0_1 = arith.constant 0 : index
    %c0_2 = arith.constant 0 : index
    %1 = vector.load %arg3[%c0_1, %c0_2] : memref<1x256xf32, #tpu.memory_space<vmem>>, vector<1x256xf32>
    %2 = vector.broadcast %1 : vector<1x256xf32> to vector<8x256xf32>
    %3 = arith.addf %0, %2 : vector<8x256xf32>
    %c0_3 = arith.constant 0 : index
    %c0_4 = arith.constant 0 : index
    %4 = vector.load %arg4[%c0_3, %c0_4] : memref<8x256xf32, #tpu.memory_space<vmem>>, vector<8x256xf32>
    tpu.vector_store %arg4[%c0_3, %c0_4], %3 {strides = array<i32>} : memref<8x256xf32, #tpu.memory_space<vmem>>, vector<8x256xf32>,
    return
  }
  func.func @transform_0(%arg0: i32, %arg1: i32) -> (i32, i32) {
    %c0_i32 = arith.constant 0 : i32
    return %arg0, %arg1 : i32, i32
  }
  func.func @transform_1(%arg0: i32, %arg1: i32) -> (i32, i32) {
    %c0_i32 = arith.constant 0 : i32
    %c0_i32_0 = arith.constant 0 : i32
    return %c0_i32, %arg1 : i32, i32
  }
  func.func @transform_2(%arg0: i32, %arg1: i32) -> (i32, i32) {
    %c0_i32 = arith.constant 0 : i32
    return %arg0, %arg1 : i32, i32
  }
}

</mosaic_0001>

<bundles_post_ra>
// kernel: tpu_custom_call.1
= control target key start
LH: loop header
LB: loop body
LE: loop exit
PB: predicated region body
PF: predicated region fallthrough
CT: control target
= control target key end

     0   :  { %7 = vsyncpa [#allocation3], 0  ;;  %s178_s0 = inlined_call_operand.hbm [shape: f32[8,256], index: 0, kind: input, shape index: {}]   ;;  %s179_s1 = inlined_call_operand.hbm [shape: f32[1,256], index: 1, kind: input, shape index: {}]   ;;  %s180_s2 = inlined_call_operand.hbm [shape: f32[8,256], index: 2, kind: output, shape index: {}]  }
   0x1   :  { %8 = vsyncpa [#allocation6], 0 }
   0x2   :  { %9 = vsyncpa [#allocation4], 0  ;;  %s15_s11 = sshll.u32 %s178_s0, 4  ;;  %s151_s12 = smov [#allocation2]   ;;  %s16_s11 = int_to_ptr.hbm [resolvable:$true] %s15_s11 }
   0x3   :  { %s17_s13 = sshll.u32 %s151_s12, 4  ;;  %s26_s16 = sshll.u32 %s179_s1, 4  ;;  %s18_s13 = int_to_ptr.vmem [resolvable:$true] %s17_s13  ;;  %s27_s16 = int_to_ptr.hbm [resolvable:$true] %s26_s16 }
   0x4   :  { %20 = dma.hbm_to_vmem [thread:$0]  %s16_s11, 256, %s18_s13, [#allocation3]  }
   0x5   :  { %s152_s17 = smov [#allocation5]  }
   0x6   :  { %s28_s18 = sshll.u32 %s152_s17, 4  ;;  %s29_s18 = int_to_ptr.vmem [resolvable:$true] %s28_s18 }
   0x7   :  { %31 = dma.hbm_to_vmem [thread:$0]  %s27_s16, 32, %s29_s18, [#allocation6]  }
   0x8   :  { %145 = dma.done.wait [#allocation3], 256  }
   0x9   :  { %146 = vsyncadd [#allocation3], 4294967040 }
   0xa   :  { %147 = dma.done.wait [#allocation6], 32  }
   0xb   :  { %148 = vsyncadd [#allocation6], 4294967264  ;;  %v40_v0 = vld [vmem:[#allocation2] sm:$0xff]  ;;  %v42_v1 = vld [vmem:[#allocation5] sm:$0x3]  ;;  %s153_s0 = smov [#allocation7]  }
   0xc   :  { %v41_v2 = vld [vmem:[#allocation2 + $0x8] sm:$0xff]  ;;  %v44_v3 = vperm.slane %v42_v1, 0  ;;  %v45_v4 = vperm.slane %v42_v1, 1  ;;  %s57_s19 = sshll.u32 %s153_s0, 4  ;;  %s59_s1 = sshll.u32 %s180_s2, 4  ;;  %s58_s19 = int_to_ptr.vmem [resolvable:$true] %s57_s19  ;;  %s60_s1 = int_to_ptr.hbm [resolvable:$true] %s59_s1 }
   0xe   :  { %v48_v5 = vadd.f32 %v44_v3, %v40_v0  ;;  %v49_v6 = vadd.f32 %v45_v4, %v41_v2 }
  0x10   :  { %50 = vst [vmem:[#allocation7] sm:$0xff] %v48_v5 }
  0x11   :  { %51 = vst [vmem:[#allocation7 + $0x8] sm:$0xff] %v49_v6 }
  0x12   :  { %62 = dma.vmem_to_hbm [thread:$0]  %s58_s19, 256, %s60_s1, [#allocation4]  }
  0x13   :  { %149 = dma.done.wait [#allocation4], 256  }
  0x14   :  { %150 = vsyncadd [#allocation4], 4294967040 }
  0x15   :  { %67 = vsyncpa [#allocation3], 1 }
  0x16   :  { %68 = vsyncpa [#allocation6], 1 }
  0x17   :  { %69 = vsyncpa [#allocation4], 1 }

</bundles_post_ra>
